<compile_context>
chip_gen: v5e
topology: v5e:2x2
jax: 0.10.0
libtpu: 0.0.40
codegen_flags: <defaults>
</compile_context>

<pallas_src>
import functools

import jax
import jax.numpy as jnp
from jax.experimental import pallas as pl
from jax.experimental.pallas import tpu as pltpu


def _round_up(x, m):
    return ((x + m - 1) // m) * m


# --------------------------------------------------------------------------
# Kernel
# --------------------------------------------------------------------------
def _concatnet_kernel(x_ref, w1_ref, b1_ref, w2_ref, b2_ref, w3_ref, out_ref):
    """One batch tile; the batch lives on the sublane (second-minor) axis.

    x_ref  : (TM, n_in)   streamed batch tile (compute dtype, e.g. bf16)
    w1_ref : (n_in, 2H)   block-diagonal fused fc1_a/fc1_b weight, transposed
    b1_ref : (1, 2H)      concat(fc1_a.bias, fc1_b.bias) row          (f32)
    w2_ref : (2H, H)      fc2.weight transposed                       (compute dtype)
    b2_ref : (1, H)       fc2.bias row                                (f32)
    w3_ref : (1, H)       fc3.weight row (no bias)                    (f32)
    out_ref: (TM, 1)      per-sample scalar output                    (f32)
    """
    x = x_ref[...]

    # fc1_a & fc1_b fused into a single block-diagonal matmul; MXU accumulates
    # in f32, bias add + ReLU stay f32 on the VPU.
    h1 = jnp.dot(x, w1_ref[...], preferred_element_type=jnp.float32) + b1_ref[...]
    h1 = jnp.maximum(h1, 0.0)

    # dropout1: identity at inference.
    # TODO(synk): training-mode stochastic dropout masking not implemented.

    # fc2 + ReLU (dot operands in the compute dtype, accumulation f32).
    h2 = jnp.dot(h1.astype(w2_ref.dtype), w2_ref[...],
                 preferred_element_type=jnp.float32) + b2_ref[...]
    h2 = jnp.maximum(h2, 0.0)

    # dropout2: identity at inference.

    # fc3 (single output, no bias): VPU multiply + cross-lane reduce keeps the
    # tiny N=1 contraction off the MXU; writes a (TM, 1) column.
    out_ref[...] = jnp.sum(h2 * w3_ref[...], axis=1, keepdims=True)


# --------------------------------------------------------------------------
# Wrapper
# --------------------------------------------------------------------------
@functools.partial(jax.jit, static_argnames=("tile_m",))
def concatnet_forward(x_batch, packed_params, *, tile_m=1024):
    """x_batch: (B, n_input_a + n_input_b) -> (B,) float32."""
    w1t, b1, w2t, b2, w3 = packed_params
    B, n_in = x_batch.shape

    # Stream x in the packed compute dtype (bf16 halves the dominant O(B) HBM
    # stream; ideally the caller already stores x in that dtype).
    x = x_batch.astype(w1t.dtype)

    # Sublane pack size for the streaming dtype: 8 for f32, 16 for bf16.
    sub = 32 // jnp.dtype(x.dtype).itemsize
    tm = max(sub, min(tile_m, _round_up(B, sub)))
    tm = _round_up(tm, sub)
    grid = (pl.cdiv(B, tm),)

    const = lambda i: (0, 0)  # weights: DMA'd once, VMEM-resident across grid

    two_h = w1t.shape[1]
    n_hidden = w2t.shape[1]
    flops = 2 * B * (n_in * two_h + two_h * n_hidden + n_hidden)
    bytes_accessed = (
        x.size * x.dtype.itemsize
        + sum(p.size * p.dtype.itemsize for p in (w1t, b1, w2t, b2, w3))
        + B * 4
    )

    out = pl.pallas_call(
        _concatnet_kernel,
        out_shape=jax.ShapeDtypeStruct((B, 1), jnp.float32),
        grid=grid,
        in_specs=[
            pl.BlockSpec((tm, n_in), lambda i: (i, 0)),  # stream batch tiles
            pl.BlockSpec(w1t.shape, const),
            pl.BlockSpec(b1.shape, const),
            pl.BlockSpec(w2t.shape, const),
            pl.BlockSpec(b2.shape, const),
            pl.BlockSpec(w3.shape, const),
        ],
        out_specs=pl.BlockSpec((tm, 1), lambda i: (i, 0)),
        compiler_params=pltpu.CompilerParams(
            dimension_semantics=("parallel",),  # shard batch tiles across TCs (v7x)
        ),
        cost_estimate=pl.CostEstimate(
            flops=flops, transcendentals=0, bytes_accessed=bytes_accessed
        ),
    )(x, w1t, b1, w2t, b2, w3)

    return out[:, 0]


# --------------------------------------------------------------------------
# Parameters (PyTorch layout) + packing into the fused kernel layout
# --------------------------------------------------------------------------
def init_params(key, n_input_a, n_input_b, n_hidden):
    """Deterministic synthetic params in PyTorch nn.Linear layout."""
    ks = jax.random.split(key, 7)

    def u(k, shape, fan_in):
        bound = 1.0 / jnp.sqrt(jnp.float32(fan_in))
        return jax.random.uniform(k, shape, jnp.float32, -bound, bound)

    w1a = u(ks[0], (n_hidden, n_input_a), n_input_a)        # fc1_a.weight
    b1a = u(ks[1], (n_hidden,), n_input_a)                  # fc1_a.bias
    w1b = u(ks[2], (n_hidden, n_input_b), n_input_b)        # fc1_b.weight
    b1b = u(ks[3], (n_hidden,), n_input_b)                  # fc1_b.bias
    w2 = u(ks[4], (n_hidden, 2 * n_hidden), 2 * n_hidden)   # fc2.weight
    b2 = u(ks[5], (n_hidden,), 2 * n_hidden)                # fc2.bias
    w3 = u(ks[6], (1, n_hidden), n_hidden)                  # fc3.weight (no bias)
    return (w1a, b1a, w1b, b1b, w2, b2, w3)


def pack_params(raw, n_input_a, n_input_b, n_hidden, *, compute_dtype=jnp.bfloat16):
    """Pack raw PyTorch-layout params into the fused, batch-on-sublane layout.

    MXU operands (fused fc1, fc2 weights) are stored in `compute_dtype`;
    biases and the fc3 row stay f32 (post-dot math is always f32).
    """
    w1a, b1a, w1b, b1b, w2, b2, w3 = raw
    n_in = n_input_a + n_input_b
    two_h = 2 * n_hidden

    # Block-diagonal fused fc1 weight; zero blocks make the fused matmul
    # exactly equivalent to the two separate Linear layers.
    w1 = jnp.zeros((two_h, n_in), jnp.float32)
    w1 = w1.at[:n_hidden, :n_input_a].set(w1a)
    w1 = w1.at[n_hidden:, n_input_a:].set(w1b)
    w1t = w1.T.astype(compute_dtype)                          # (n_in, 2H)
    b1 = jnp.concatenate([b1a, b1b]).reshape(1, two_h).astype(jnp.float32)

    w2t = w2.T.astype(compute_dtype)                          # (2H, H)
    b2r = b2.reshape(1, n_hidden).astype(jnp.float32)
    w3r = w3.reshape(1, n_hidden).astype(jnp.float32)         # fc3 row (VPU/XLU path)
    return (w1t, b1, w2t, b2r, w3r)


# --------------------------------------------------------------------------
# Plain-JAX reference (mirrors the PyTorch forward, eval mode)
# --------------------------------------------------------------------------
def reference_forward(x, raw, n_input_a):
    w1a, b1a, w1b, b1b, w2, b2, w3 = raw
    x_a = x[:n_input_a]
    x_b = x[n_input_a:]
    h_a = jnp.maximum(w1a @ x_a + b1a, 0.0)
    h_b = jnp.maximum(w1b @ x_b + b1b, 0.0)
    h = jnp.concatenate([h_a, h_b], axis=0)
    h2 = jnp.maximum(w2 @ h + b2, 0.0)
    return w3 @ h2  # (1,)


# --------------------------------------------------------------------------
if __name__ == "__main__":
    n_input_a, n_input_b, n_hidden = 24, 8, 32
    n_in = n_input_a + n_input_b

    key = jax.random.PRNGKey(0)
    k_param, k_x = jax.random.split(key)
    raw = init_params(k_param, n_input_a, n_input_b, n_hidden)
    ref_fn = jax.vmap(lambda xi: reference_forward(xi, raw, n_input_a)[0])

    packed_f32 = pack_params(raw, n_input_a, n_input_b, n_hidden,
                             compute_dtype=jnp.float32)
    packed_bf16 = pack_params(raw, n_input_a, n_input_b, n_hidden,
                              compute_dtype=jnp.bfloat16)

    # Case 1: multi-step grid, full tiles (exercise the streaming pipeline).
    B1 = 64
    x1 = jax.random.normal(k_x, (B1, n_in), jnp.float32)
    ref1 = ref_fn(x1)

    out1_f32 = jax.block_until_ready(concatnet_forward(x1, packed_f32, tile_m=16))
    assert out1_f32.shape == (B1,)
    assert jnp.allclose(out1_f32, ref1, atol=1e-4, rtol=1e-4), (out1_f32, ref1)

    out1_bf16 = jax.block_until_ready(concatnet_forward(x1, packed_bf16, tile_m=16))
    assert out1_bf16.shape == (B1,)
    assert jnp.allclose(out1_bf16, ref1, atol=2e-2, rtol=2e-2), (out1_bf16, ref1)

    # Case 2: batch not a multiple of the tile (partial last block masked).
    B2 = 20
    x2 = jax.random.normal(jax.random.fold_in(k_x, 1), (B2, n_in), jnp.float32)
    ref2 = ref_fn(x2)
    out2 = jax.block_until_ready(concatnet_forward(x2, packed_f32, tile_m=8))
    assert out2.shape == (B2,)
    assert jnp.allclose(out2, ref2, atol=1e-4, rtol=1e-4), (out2, ref2)

    print("KERNEL_OK")
</pallas_src>

<mosaic_0001>
module attributes {stable_mosaic.version = 11 : i64} {
  func.func @_concatnet_kernel(%arg0: i32, %arg1: memref<16x32xf32, #tpu.memory_space<vmem>>, %arg2: memref<32x64xf32, #tpu.memory_space<vmem>>, %arg3: memref<1x64xf32, #tpu.memory_space<vmem>>, %arg4: memref<64x32xf32, #tpu.memory_space<vmem>>, %arg5: memref<1x32xf32, #tpu.memory_space<vmem>>, %arg6: memref<1x32xf32, #tpu.memory_space<vmem>>, %arg7: memref<16x1xf32, #tpu.memory_space<vmem>>) attributes {dimension_semantics = [#tpu.dimension_semantics<parallel>], iteration_bounds = array<i64: 4>, scalar_prefetch = 0 : i64, scratch_operands = 0 : i64, tpu.core_type = #tpu.core_type<tc>, window_params = [{transform_indices = @transform_0, window_bounds = array<i64: 16, 32>}, {pipeline_mode = #tpu.pipeline_mode<synchronous>, transform_indices = @transform_1, window_bounds = array<i64: 32, 64>}, {pipeline_mode = #tpu.pipeline_mode<synchronous>, transform_indices = @transform_2, window_bounds = array<i64: 1, 64>}, {pipeline_mode = #tpu.pipeline_mode<synchronous>, transform_indices = @transform_3, window_bounds = array<i64: 64, 32>}, {pipeline_mode = #tpu.pipeline_mode<synchronous>, transform_indices = @transform_4, window_bounds = array<i64: 1, 32>}, {pipeline_mode = #tpu.pipeline_mode<synchronous>, transform_indices = @transform_5, window_bounds = array<i64: 1, 32>}, {transform_indices = @transform_6, window_bounds = array<i64: 16, 1>}]} {
    %c0 = arith.constant 0 : index
    %c0_0 = arith.constant 0 : index
    %0 = vector.load %arg1[%c0, %c0_0] : memref<16x32xf32, #tpu.memory_space<vmem>>, vector<16x32xf32>
    %c0_1 = arith.constant 0 : index
    %c0_2 = arith.constant 0 : index
    %1 = vector.load %arg2[%c0_1, %c0_2] : memref<32x64xf32, #tpu.memory_space<vmem>>, vector<32x64xf32>
    %cst = arith.constant dense<0.000000e+00> : vector<16x64xf32>
    %2 = tpu.matmul %0, %1, %cst {dimension_numbers = #tpu.dot_dimension_numbers<[1], [0], [0], [1], [0, 0, 1, 1], [], []>} : vector<16x32xf32>, vector<32x64xf32>, vector<16x64xf32> -> vector<16x64xf32>
    %c0_3 = arith.constant 0 : index
    %c0_4 = arith.constant 0 : index
    %3 = vector.load %arg3[%c0_3, %c0_4] : memref<1x64xf32, #tpu.memory_space<vmem>>, vector<1x64xf32>
    %4 = vector.broadcast %3 : vector<1x64xf32> to vector<16x64xf32>
    %5 = arith.addf %2, %4 : vector<16x64xf32>
    %cst_5 = arith.constant 0.000000e+00 : f32
    %6 = vector.broadcast %cst_5 : f32 to vector<16x64xf32>
    %7 = arith.maximumf %5, %6 : vector<16x64xf32>
    %c0_6 = arith.constant 0 : index
    %c0_7 = arith.constant 0 : index
    %8 = vector.load %arg4[%c0_6, %c0_7] : memref<64x32xf32, #tpu.memory_space<vmem>>, vector<64x32xf32>
    %cst_8 = arith.constant dense<0.000000e+00> : vector<16x32xf32>
    %9 = tpu.matmul %7, %8, %cst_8 {dimension_numbers = #tpu.dot_dimension_numbers<[1], [0], [0], [1], [0, 0, 1, 1], [], []>} : vector<16x64xf32>, vector<64x32xf32>, vector<16x32xf32> -> vector<16x32xf32>
    %c0_9 = arith.constant 0 : index
    %c0_10 = arith.constant 0 : index
    %10 = vector.load %arg5[%c0_9, %c0_10] : memref<1x32xf32, #tpu.memory_space<vmem>>, vector<1x32xf32>
    %11 = vector.broadcast %10 : vector<1x32xf32> to vector<16x32xf32>
    %12 = arith.addf %9, %11 : vector<16x32xf32>
    %cst_11 = arith.constant 0.000000e+00 : f32
    %13 = vector.broadcast %cst_11 : f32 to vector<16x32xf32>
    %14 = arith.maximumf %12, %13 : vector<16x32xf32>
    %c0_12 = arith.constant 0 : index
    %c0_13 = arith.constant 0 : index
    %15 = vector.load %arg6[%c0_12, %c0_13] : memref<1x32xf32, #tpu.memory_space<vmem>>, vector<1x32xf32>
    %16 = vector.broadcast %15 : vector<1x32xf32> to vector<16x32xf32>
    %17 = arith.mulf %14, %16 : vector<16x32xf32>
    %cst_14 = arith.constant dense<0.000000e+00> : vector<16xf32>
    %18 = vector.multi_reduction <add>, %17, %cst_14 [1] : vector<16x32xf32> to vector<16xf32>
    %19 = vector.shape_cast %18 : vector<16xf32> to vector<16x1xf32>
    %c0_15 = arith.constant 0 : index
    %c0_16 = arith.constant 0 : index
    %20 = vector.load %arg7[%c0_15, %c0_16] : memref<16x1xf32, #tpu.memory_space<vmem>>, vector<16x1xf32>
    tpu.vector_store %arg7[%c0_15, %c0_16], %19 {strides = array<i32>} : memref<16x1xf32, #tpu.memory_space<vmem>>, vector<16x1xf32>,
    return
  }
  func.func @transform_0(%arg0: i32) -> (i32, i32) {
    %c0_i32 = arith.constant 0 : i32
    %c0_i32_0 = arith.constant 0 : i32
    return %arg0, %c0_i32 : i32, i32
  }
  func.func @transform_1(%arg0: i32) -> (i32, i32) {
    %c0_i32 = arith.constant 0 : i32
    %c0_i32_0 = arith.constant 0 : i32
    %c0_i32_1 = arith.constant 0 : i32
    return %c0_i32, %c0_i32_0 : i32, i32
  }
  func.func @transform_2(%arg0: i32) -> (i32, i32) {
    %c0_i32 = arith.constant 0 : i32
    %c0_i32_0 = arith.constant 0 : i32
    %c0_i32_1 = arith.constant 0 : i32
    return %c0_i32, %c0_i32_0 : i32, i32
  }
  func.func @transform_3(%arg0: i32) -> (i32, i32) {
    %c0_i32 = arith.constant 0 : i32
    %c0_i32_0 = arith.constant 0 : i32
    %c0_i32_1 = arith.constant 0 : i32
    return %c0_i32, %c0_i32_0 : i32, i32
  }
  func.func @transform_4(%arg0: i32) -> (i32, i32) {
    %c0_i32 = arith.constant 0 : i32
    %c0_i32_0 = arith.constant 0 : i32
    %c0_i32_1 = arith.constant 0 : i32
    return %c0_i32, %c0_i32_0 : i32, i32
  }
  func.func @transform_5(%arg0: i32) -> (i32, i32) {
    %c0_i32 = arith.constant 0 : i32
    %c0_i32_0 = arith.constant 0 : i32
    %c0_i32_1 = arith.constant 0 : i32
    return %c0_i32, %c0_i32_0 : i32, i32
  }
  func.func @transform_6(%arg0: i32) -> (i32, i32) {
    %c0_i32 = arith.constant 0 : i32
    %c0_i32_0 = arith.constant 0 : i32
    return %arg0, %c0_i32 : i32, i32
  }
}

</mosaic_0001>

<bundles_post_ra>
// kernel: concatnet_forward.1
= control target key start
LH: loop header
LB: loop body
LE: loop exit
PB: predicated region body
PF: predicated region fallthrough
CT: control target
= control target key end

     0   :  { %s493_s21 = smov 0   ;;  %s566_s0 = inlined_call_operand.vmem [shape: f32[64,32], index: 0, kind: input, shape index: {}]   ;;  %s567_s1 = inlined_call_operand.vmem [shape: f32[32,64], index: 1, kind: input, shape index: {}]   ;;  %s568_s2 = inlined_call_operand.vmem [shape: f32[1,64], index: 2, kind: input, shape index: {}]   ;;  %s569_s3 = inlined_call_operand.vmem [shape: f32[64,32], index: 3, kind: input, shape index: {}]   ;;  %s570_s4 = inlined_call_operand.vmem [shape: f32[1,32], index: 4, kind: input, shape index: {}]   ;;  %s571_s5 = inlined_call_operand.vmem [shape: f32[1,32], index: 5, kind: input, shape index: {}]   ;;  %s572_s6 = inlined_call_operand.vmem [shape: f32[64,1], index: 6, kind: output, shape index: {}]  }
   0x1 LB: > { %s412_s22 = sadd.s32 4294967295, %s456_s21   ;;  %p416_p0 = scmp.ge.s32.totalorder %s456_s21, 1  ;;  %s456_s21 = sphi %s493_s21, %s16_s21  }
   0x2   : > { %p213_p1 = scmp.lt.s32.totalorder %s456_s21, 5 }
   0x4   : > { %p214_p2 = pnand %p416_p0, %p213_p1 }
   0x5   : > { %s417_s27 = sshll.u32 (!%p214_p2), %s412_s22, 1 }
   0x6   : > { %217 = sbr.rel (%p214_p2) target bundleno = 411 (0x19b), region = 44  ;;  %p244_p3 = scmp.lt.s32.totalorder (!%p214_p2), %s417_s27, 7 }
   0xb   : > { %v260_v0 = vld [vmem:[%s567_s1 + $0x18] sm:$0xff]  ;;  %v259_v1 = vld [vmem:[%s567_s1 + $0x10] sm:$0xff]  ;;  %v258_v4 = vld [vmem:[%s567_s1 + $0x8] sm:$0xff]  ;;  %s574_s27 = smov (!%p244_p3, %s417_s27), 7  ;;  %vm265_vm0 = vcmask 261120   ;;  %vm309_vm1 = vcmask 523264  }
   0xc   : > { %427 = vmatpush.msra.mxu3 %v260_v0  ;;  %284 = vmatpush.msra.mxu0 %v260_v0  ;;  %v304_v2 = vld [vmem:[%s569_s3 + $0x38] sm:$0xff]  ;;  %v303_v3 = vld [vmem:[%s569_s3 + $0x30] sm:$0xff]  ;;  %v302_v5 = vld [vmem:[%s569_s3 + $0x28] sm:$0xff]  ;;  %s418_s14 = sshll.u32 %s574_s27, 3  ;;  %vm353_vm2 = vcmask 7168  }
   0xd   : > { %324 = vmatpush.msra.mxu1 %v304_v2  ;;  %431 = vmatpush.msra.mxu2 %v304_v2  ;;  %v257_v6 = vld [vmem:[%s567_s1] sm:$0xff]  ;;  %s247_s17 = scalar_lea.vmem %s566_s0, %s418_s14  ;;  %v300_v10 = vld [vmem:[%s569_s3 + $0x18] sm:$0xff]  ;;  %v299_v11 = vld [vmem:[%s569_s3 + $0x10] sm:$0xff]  ;;  %s253_s15 = scalar_lea.vmem %s572_s6, %s418_s14 }
   0xe   : > { %428 = vmatpush.msra.mxu3 %v259_v1  ;;  %285 = vmatpush.msra.mxu0 %v259_v1  ;;  %v301_v7 = vld [vmem:[%s569_s3 + $0x20] sm:$0xff]  ;;  %v256_v8 = vld [vmem:[%s247_s17 + $0x8] sm:$0xff] }
   0xf   : > { %325 = vmatpush.msra.mxu1 %v303_v3  ;;  %432 = vmatpush.msra.mxu2 %v303_v3  ;;  %v255_v9 = vld [vmem:[%s247_s17] sm:$0xff]  ;;  %v298_v12 = vld [vmem:[%s569_s3 + $0x8] sm:$0xff] }
  0x10   : > { %429 = vmatpush.msra.mxu3 %v258_v4  ;;  %286 = vmatpush.msra.mxu0 %v258_v4  ;;  %v297_v13 = vld [vmem:[%s569_s3] sm:$0xff] }
  0x11   : > { %326 = vmatpush.msra.mxu1 %v302_v5  ;;  %433 = vmatpush.msra.mxu2 %v302_v5  ;;  %v447_v14 = vld [vmem:[%s568_s2] ss:$0 sm:$0xff] }
  0x12   : > { %430 = vmatpush.msra.mxu3 %v257_v6  ;;  %287 = vmatpush.msra.mxu0 %v257_v6  ;;  %v448_v21 = vld [vmem:[%s570_s4] ss:$0 sm:$0xff] }
  0x13   : > { %422 = vmatmul.msk.f32.vlgmr.msra.gmra.mxu3 %vm265_vm0, %v256_v8  ;;  %421 = vmatmul.msk.f32.vlgmr.msra.gmra.mxu0 %vm265_vm0, %v255_v9  ;;  %v449_v24 = vld [vmem:[%s571_s5] ss:$0 sm:$0xff] }
  0x14   : > { %327 = vmatpush.msra.mxu1 %v301_v7  ;;  %434 = vmatpush.msra.mxu2 %v301_v7 }
  0x16   : > { %328 = vmatpush.msra.mxu1 %v300_v10  ;;  %435 = vmatpush.msra.mxu2 %v300_v10 }
  0x18   : > { %329 = vmatpush.msra.mxu1 %v299_v11  ;;  %436 = vmatpush.msra.mxu2 %v299_v11 }
  0x1a   : > { %330 = vmatpush.msra.mxu1 %v298_v12  ;;  %437 = vmatpush.msra.mxu2 %v298_v12 }
  0x1c   : > { %331 = vmatpush.msra.mxu1 %v297_v13  ;;  %438 = vmatpush.msra.mxu2 %v297_v13 }
  0x90   : > { %v289_v15 = vpop.f32.mrf.mxu0 }
  0x91   : > { %v290_v16 = vadd.f32 %v447_v14, %v289_v15 }
  0x93   : > { %v295_v17 = vmax.f32 %v290_v16, 0.0 }
  0x95   : > { %423 = vmatmul.msk.f32.vlgmr.msra.gmra.mxu1 %vm309_vm1, %v295_v17 }
  0x96   : > { %v292_v18 = vpop.f32.mrf.mxu3 }
  0x97   : > { %v293_v19 = vadd.f32 %v447_v14, %v292_v18 }
  0x99   : > { %v296_v20 = vmax.f32 %v293_v19, 0.0 }
  0x9b   : > { %424 = vmatmul.msk.f32.vlgmr.msra.gmra.mxu2 %vm309_vm1, %v296_v20 }
 0x112   : > { %v333_v22 = vpop.f32.mrf.mxu1 }
 0x113   : > { %v334_v23 = vadd.f32 %v448_v21, %v333_v22 }
 0x115   : > { %v339_v25 = vmax.f32 %v334_v23, 0.0 }
 0x117   : > { %v345_v26 = vmul.f32 %v449_v24, %v339_v25 }
 0x119   : > { %v347_v27 = vsel %vm265_vm0, %v345_v26, 0.0 }
 0x11a   : > { %348 = vadd.xlane.f32.xlu0 %v347_v27 }
 0x11e   : > { %v336_v28 = vpop.f32.mrf.mxu2 }
 0x11f   : > { %v337_v29 = vadd.f32 %v448_v21, %v336_v28 }
 0x121   : > { %v340_v30 = vmax.f32 %v337_v29, 0.0 }
 0x123   : > { %v346_v31 = vmul.f32 %v449_v24, %v340_v30 }
 0x125   : > { %v350_v32 = vsel %vm265_vm0, %v346_v31, 0.0 }
 0x126   : > { %351 = vadd.xlane.f32.xlu0 %v350_v32 }
 0x18d   : > { %v349_v33 = vpop.xlane.xlu0 %348 }
 0x18e   : > { %354 = vst.msk [vmem:[%s253_s15] sm:$0xff] %vm353_vm2, %v349_v33 }
 0x199   : > { %v352_v34 = vpop.xlane.xlu0 %351 }
 0x19a   : > { %355 = vst.msk [vmem:[%s253_s15 + $0x8] sm:$0xff] %vm353_vm2, %v352_v34 }
 0x19b PF: > { %s16_s21 = sadd.s32 1, %s456_s21  }
 0x19c   : > { %p13_p4 = scmp.ge.s32.totalorder %s16_s21, 6  }
 0x19e   :  { %15 = sbr.rel (!%p13_p4) target bundleno = 1 (0x1), region = 74 }

</bundles_post_ra>
